<compile_context>
chip_gen: v7x
topology: tpu7x:2x2x1
jax: 0.10.0
libtpu: 0.0.40
codegen_flags: <defaults>
</compile_context>

<pallas_src>
import jax
import jax.numpy as jnp
import numpy as np
from jax import lax
from jax.experimental import pallas as pl
from jax.experimental.pallas import tpu as pltpu


def _acn_kernel(x_ref, w1_ref, b1_ref, w2_ref, b2_ref, w3_ref, b3_ref, o_ref,
                xcat_ref, hcat_ref):
    """One grid step = `bt` batch elements packed along lanes (channels on sublanes).

    x_ref    : (bt, C, L)    input activations (compute dtype)
    w1_ref   : (F, 3C)       fused k=3 conv-1 weight, column index = k*C + c
    b1_ref   : (F, 1)        f32
    w2_ref   : (F, F)        k=1 conv-2 weight, (out, in)
    b2_ref   : (F, 1)        f32
    w3_ref   : (2C, 3F)      fused k=3 conv-3 weight, column index = k*F + f
    b3_ref   : (2C, 1)       f32
    o_ref    : (bt, 2C, L)   output (f32)
    xcat_ref : (3C, bt*L)    VMEM scratch: sublane-stacked shifted input taps
    hcat_ref : (3F, bt*L)    VMEM scratch: sublane-stacked shifted hidden taps
    """
    bt, C, L = x_ref.shape
    F = w2_ref.shape[0]
    N = bt * L                          # packed lane width for this grid step
    cdt = xcat_ref.dtype                # MXU operand dtype (f32 or bf16)

    w1 = w1_ref[...]
    b1 = b1_ref[...]
    w2 = w2_ref[...]
    b2 = b2_ref[...]
    w3 = w3_ref[...]
    b3 = b3_ref[...]

    # ---- Pack the bt batch elements along lanes: center-tap slab is x itself. -----------------
    for b in range(bt):
        xcat_ref[C:2 * C, b * L:(b + 1) * L] = x_ref[b].astype(cdt)
    xc = xcat_ref[C:2 * C, :]                                   # (C, N) packed input

    # Shifted-tap slabs.  A single lane mask zeroes the conv "same"-padding column at every
    # batch boundary (column p+1 of the l-1 tap / column p of the l+1 tap must be 0 whenever
    # p % L == L-1, i.e. p is the last column of a batch element).
    if N > 1:
        keep_c = (lax.broadcasted_iota(jnp.int32, (C, N - 1), 1) % L) != (L - 1)
        zc = jnp.zeros((C, N - 1), cdt)
        xcat_ref[0:C, 1:N] = jnp.where(keep_c, xc[:, 0:N - 1], zc)          # tap x[l-1]
        xcat_ref[2 * C:3 * C, 0:N - 1] = jnp.where(keep_c, xc[:, 1:N], zc)  # tap x[l+1]
    # True padding columns at the two ends of the packed row.
    xcat_ref[0:C, 0:1] = jnp.zeros((C, 1), cdt)
    xcat_ref[2 * C:3 * C, N - 1:N] = jnp.zeros((C, 1), cdt)

    # ---- Conv1d(C -> F, k=3, pad=1): ONE (F, 3C) @ (3C, N) matmul. ----------------------------
    h1 = jnp.dot(w1, xcat_ref[...], preferred_element_type=jnp.float32) + b1   # (F, N) f32
    h1 = jnp.maximum(h1, 0.0)

    # ---- Conv1d(F -> F, k=1): plain matmul. ----------------------------------------------------
    h2 = jnp.dot(w2, h1.astype(cdt), preferred_element_type=jnp.float32) + b2  # (F, N) f32
    h2 = jnp.maximum(h2, 0.0).astype(cdt)

    # ---- Conv1d(F -> 2C, k=3, pad=1): ONE (2C, 3F) @ (3F, N) matmul. --------------------------
    hcat_ref[F:2 * F, :] = h2
    if N > 1:
        keep_f = (lax.broadcasted_iota(jnp.int32, (F, N - 1), 1) % L) != (L - 1)
        zf = jnp.zeros((F, N - 1), cdt)
        hcat_ref[0:F, 1:N] = jnp.where(keep_f, h2[:, 0:N - 1], zf)
        hcat_ref[2 * F:3 * F, 0:N - 1] = jnp.where(keep_f, h2[:, 1:N], zf)
    hcat_ref[0:F, 0:1] = jnp.zeros((F, 1), cdt)
    hcat_ref[2 * F:3 * F, N - 1:N] = jnp.zeros((F, 1), cdt)

    out = jnp.dot(w3, hcat_ref[...], preferred_element_type=jnp.float32) + b3  # (2C, N) f32

    # ---- Unpack lanes back to the NCL output block. --------------------------------------------
    for b in range(bt):
        o_ref[b] = out[:, b * L:(b + 1) * L].astype(o_ref.dtype)


def _pick_batch_block(batch, length, target_lanes=512):
    """Pick how many batch elements to fold into one grid step.

    Targets a lane-dense packed width (bt*L around `target_lanes`, at least 128 when possible)
    while preferring to leave >= 2 grid steps so both v7x TensorCores get work.
    """
    cap = max(1, target_lanes // max(length, 1))
    divisors = [d for d in range(1, batch + 1) if batch % d == 0]
    ok = [d for d in divisors if d <= cap] or [1]
    dense = [d for d in ok if d * length >= 128]
    two_step = [d for d in (dense or ok) if batch // d >= 2]
    if two_step:
        return max(two_step)
    return max(dense or ok)


def affine_coupling_network(x_ncl, params, *, compute_dtype=jnp.float32, target_lanes=512):
    """Conv1d(C->F,k3,p1) -> ReLU -> Conv1d(F->F,k1) -> ReLU -> Conv1d(F->2C,k3,p1).

    x_ncl: (B, C, L) PyTorch NCL layout.  Returns (B, 2C, L) float32.
    compute_dtype: dtype of the MXU operands (jnp.float32 or jnp.bfloat16); accumulation,
    biases and ReLU stay float32.
    """
    w1, b1, w2, b2, w3, b3 = params       # (3,C,F) (1,F) (F,F) (1,F) (3,F,2C) (1,2C)
    B, C, L = x_ncl.shape
    F = w1.shape[2]
    C2 = w3.shape[2]

    # Host-side (tiny, one-off) weight fusion / relayout: each k=3 conv becomes a single matmul
    # against sublane-stacked shifted taps.
    w1f = jnp.transpose(w1.reshape(3 * C, F)).astype(compute_dtype)     # (F, 3C)
    w2f = jnp.transpose(w2).astype(compute_dtype)                       # (F, F)  (out, in)
    w3f = jnp.transpose(w3.reshape(3 * F, C2)).astype(compute_dtype)    # (2C, 3F)
    b1f = jnp.transpose(b1).astype(jnp.float32)                         # (F, 1)
    b2f = jnp.transpose(b2).astype(jnp.float32)                         # (F, 1)
    b3f = jnp.transpose(b3).astype(jnp.float32)                         # (2C, 1)

    x = x_ncl.astype(compute_dtype)
    bt = _pick_batch_block(B, L, target_lanes)

    return pl.pallas_call(
        _acn_kernel,
        out_shape=jax.ShapeDtypeStruct((B, C2, L), jnp.float32),
        grid_spec=pltpu.PrefetchScalarGridSpec(
            num_scalar_prefetch=0,
            grid=(B // bt,),
            in_specs=[
                pl.BlockSpec((bt, C, L), lambda i: (i, 0, 0)),
                pl.BlockSpec((F, 3 * C), lambda i: (0, 0)),
                pl.BlockSpec((F, 1), lambda i: (0, 0)),
                pl.BlockSpec((F, F), lambda i: (0, 0)),
                pl.BlockSpec((F, 1), lambda i: (0, 0)),
                pl.BlockSpec((C2, 3 * F), lambda i: (0, 0)),
                pl.BlockSpec((C2, 1), lambda i: (0, 0)),
            ],
            out_specs=pl.BlockSpec((bt, C2, L), lambda i: (i, 0, 0)),
            scratch_shapes=[
                pltpu.VMEM((3 * C, bt * L), compute_dtype),
                pltpu.VMEM((3 * F, bt * L), compute_dtype),
            ],
        ),
        compiler_params=pltpu.CompilerParams(
            dimension_semantics=("parallel",),
            vmem_limit_bytes=48 * 1024 * 1024,
        ),
    )(x, w1f, b1f, w2f, b2f, w3f, b3f)


def _reference(x_ncl, params):
    """Pure-JAX reference using lax.conv (cross-correlation, NCW layout)."""
    w1, b1, w2, b2, w3, b3 = params

    def conv(x, w_kio, b_1o, pad):
        rhs = jnp.transpose(w_kio, (2, 1, 0))          # (k, in, out) -> OIW
        y = lax.conv_general_dilated(
            x, rhs, window_strides=(1,), padding=[(pad, pad)],
            dimension_numbers=("NCW", "OIW", "NCW"))
        return y + b_1o.reshape(1, -1, 1)

    h = jax.nn.relu(conv(x_ncl, w1, b1, 1))
    h = jax.nn.relu(conv(h, w2[None], b2, 0))          # w2 (F,F) -> (k=1, in, out)
    return conv(h, w3, b3, 1)


def make_params(key, in_channels, n_filters):
    k1, k2, k3, k4, k5, k6 = jax.random.split(key, 6)
    w1 = 0.1 * jax.random.normal(k1, (3, in_channels, n_filters), jnp.float32)
    b1 = 0.1 * jax.random.normal(k2, (1, n_filters), jnp.float32)
    w2 = 0.1 * jax.random.normal(k3, (n_filters, n_filters), jnp.float32)
    b2 = 0.1 * jax.random.normal(k4, (1, n_filters), jnp.float32)
    w3 = 0.1 * jax.random.normal(k5, (3, n_filters, 2 * in_channels), jnp.float32)
    b3 = 0.1 * jax.random.normal(k6, (1, 2 * in_channels), jnp.float32)
    return (w1, b1, w2, b2, w3, b3)


if __name__ == "__main__":
    B, C, L, F = 4, 4, 16, 32
    key = jax.random.PRNGKey(0)
    kx, kp = jax.random.split(key)
    x = jax.random.normal(kx, (B, C, L), jnp.float32)
    params = make_params(kp, C, F)

    fwd = jax.jit(affine_coupling_network)
    out = jax.block_until_ready(fwd(x, params))
    assert out.shape == (B, 2 * C, L), out.shape

    ref = jax.block_until_ready(_reference(x, params))
    np.testing.assert_allclose(np.asarray(out), np.asarray(ref), rtol=1e-5, atol=1e-5)

    # bf16-on-the-MXU fast path (f32 accumulation) -- looser tolerance.
    fwd_bf16 = jax.jit(lambda xx, pp: affine_coupling_network(
        xx, pp, compute_dtype=jnp.bfloat16))
    out_bf16 = jax.block_until_ready(fwd_bf16(x, params))
    np.testing.assert_allclose(np.asarray(out_bf16), np.asarray(ref), rtol=5e-2, atol=5e-2)

    print("KERNEL_OK")
</pallas_src>

<mosaic_0001>
module attributes {stable_mosaic.version = 11 : i64} {
  func.func @_acn_kernel(%arg0: i32, %arg1: memref<2x4x16xf32, #tpu.memory_space<vmem>>, %arg2: memref<32x12xf32, #tpu.memory_space<vmem>>, %arg3: memref<32x1xf32, #tpu.memory_space<vmem>>, %arg4: memref<32x32xf32, #tpu.memory_space<vmem>>, %arg5: memref<32x1xf32, #tpu.memory_space<vmem>>, %arg6: memref<8x96xf32, #tpu.memory_space<vmem>>, %arg7: memref<8x1xf32, #tpu.memory_space<vmem>>, %arg8: memref<2x8x16xf32, #tpu.memory_space<vmem>>, %arg9: memref<12x32xf32, #tpu.memory_space<vmem>>, %arg10: memref<96x32xf32, #tpu.memory_space<vmem>>) attributes {dimension_semantics = [#tpu.dimension_semantics<parallel>], iteration_bounds = array<i64: 2>, scalar_prefetch = 0 : i64, scratch_operands = 2 : i64, tpu.core_type = #tpu.core_type<tc>, window_params = [{transform_indices = @transform_0, window_bounds = array<i64: 2, 4, 16>}, {pipeline_mode = #tpu.pipeline_mode<synchronous>, transform_indices = @transform_1, window_bounds = array<i64: 32, 12>}, {pipeline_mode = #tpu.pipeline_mode<synchronous>, transform_indices = @transform_2, window_bounds = array<i64: 32, 1>}, {pipeline_mode = #tpu.pipeline_mode<synchronous>, transform_indices = @transform_3, window_bounds = array<i64: 32, 32>}, {pipeline_mode = #tpu.pipeline_mode<synchronous>, transform_indices = @transform_4, window_bounds = array<i64: 32, 1>}, {pipeline_mode = #tpu.pipeline_mode<synchronous>, transform_indices = @transform_5, window_bounds = array<i64: 8, 96>}, {pipeline_mode = #tpu.pipeline_mode<synchronous>, transform_indices = @transform_6, window_bounds = array<i64: 8, 1>}, {transform_indices = @transform_7, window_bounds = array<i64: 2, 8, 16>}]} {
    %c0 = arith.constant 0 : index
    %c0_0 = arith.constant 0 : index
    %0 = vector.load %arg2[%c0, %c0_0] : memref<32x12xf32, #tpu.memory_space<vmem>>, vector<32x12xf32>
    %c0_1 = arith.constant 0 : index
    %c0_2 = arith.constant 0 : index
    %1 = vector.load %arg3[%c0_1, %c0_2] : memref<32x1xf32, #tpu.memory_space<vmem>>, vector<32x1xf32>
    %c0_3 = arith.constant 0 : index
    %c0_4 = arith.constant 0 : index
    %2 = vector.load %arg4[%c0_3, %c0_4] : memref<32x32xf32, #tpu.memory_space<vmem>>, vector<32x32xf32>
    %c0_5 = arith.constant 0 : index
    %c0_6 = arith.constant 0 : index
    %3 = vector.load %arg5[%c0_5, %c0_6] : memref<32x1xf32, #tpu.memory_space<vmem>>, vector<32x1xf32>
    %c0_7 = arith.constant 0 : index
    %c0_8 = arith.constant 0 : index
    %4 = vector.load %arg6[%c0_7, %c0_8] : memref<8x96xf32, #tpu.memory_space<vmem>>, vector<8x96xf32>
    %c0_9 = arith.constant 0 : index
    %c0_10 = arith.constant 0 : index
    %5 = vector.load %arg7[%c0_9, %c0_10] : memref<8x1xf32, #tpu.memory_space<vmem>>, vector<8x1xf32>
    %c0_11 = arith.constant 0 : index
    %c0_12 = arith.constant 0 : index
    %c0_13 = arith.constant 0 : index
    %6 = vector.load %arg1[%c0_11, %c0_12, %c0_13] : memref<2x4x16xf32, #tpu.memory_space<vmem>>, vector<1x4x16xf32>
    %7 = vector.shape_cast %6 : vector<1x4x16xf32> to vector<4x16xf32>
    %c4 = arith.constant 4 : index
    %c0_14 = arith.constant 0 : index
    %8 = vector.load %arg9[%c4, %c0_14] : memref<12x32xf32, #tpu.memory_space<vmem>>, vector<4x16xf32>
    tpu.vector_store %arg9[%c4, %c0_14], %7 {strides = array<i32>} : memref<12x32xf32, #tpu.memory_space<vmem>>, vector<4x16xf32>,
    %c1 = arith.constant 1 : index
    %c0_15 = arith.constant 0 : index
    %c0_16 = arith.constant 0 : index
    %9 = vector.load %arg1[%c1, %c0_15, %c0_16] : memref<2x4x16xf32, #tpu.memory_space<vmem>>, vector<1x4x16xf32>
    %10 = vector.shape_cast %9 : vector<1x4x16xf32> to vector<4x16xf32>
    %c4_17 = arith.constant 4 : index
    %c16 = arith.constant 16 : index
    %11 = vector.load %arg9[%c4_17, %c16] : memref<12x32xf32, #tpu.memory_space<vmem>>, vector<4x16xf32>
    tpu.vector_store %arg9[%c4_17, %c16], %10 {strides = array<i32>} : memref<12x32xf32, #tpu.memory_space<vmem>>, vector<4x16xf32>,
    %c4_18 = arith.constant 4 : index
    %c0_19 = arith.constant 0 : index
    %12 = vector.load %arg9[%c4_18, %c0_19] : memref<12x32xf32, #tpu.memory_space<vmem>>, vector<4x32xf32>
    %13 = tpu.iota {dimensions = array<i32: 1>} : vector<4x31xi32>
    %c16_i32 = arith.constant 16 : i32
    %c0_i32 = arith.constant 0 : i32
    %14 = arith.cmpi eq, %c16_i32, %c0_i32 : i32
    %c1_i32 = arith.constant 1 : i32
    %15 = arith.select %14, %c1_i32, %c16_i32 : i32
    %16 = vector.broadcast %15 : i32 to vector<4x31xi32>
    %17 = arith.remsi %13, %16 : vector<4x31xi32>
    %c0_i32_20 = arith.constant 0 : i32
    %18 = vector.broadcast %c0_i32_20 : i32 to vector<4x31xi32>
    %19 = arith.cmpi ne, %17, %18 : vector<4x31xi32>
    %c0_i32_21 = arith.constant 0 : i32
    %20 = vector.broadcast %c0_i32_21 : i32 to vector<4x31xi32>
    %21 = arith.cmpi slt, %17, %20 : vector<4x31xi32>
    %c0_i32_22 = arith.constant 0 : i32
    %22 = arith.cmpi slt, %15, %c0_i32_22 : i32
    %23 = vector.broadcast %22 : i1 to vector<4x31xi1>
    %24 = vector.broadcast %23 : vector<4x31xi1> to vector<4x31xi1>
    %25 = arith.xori %21, %24 : vector<4x31xi1>
    %26 = arith.andi %25, %19 : vector<4x31xi1>
    %27 = vector.broadcast %15 : i32 to vector<4x31xi32>
    %28 = arith.addi %17, %27 : vector<4x31xi32>
    %29 = arith.select %26, %28, %17 : vector<4x31xi1>, vector<4x31xi32>
    %c15_i32 = arith.constant 15 : i32
    %30 = vector.broadcast %c15_i32 : i32 to vector<4x31xi32>
    %31 = arith.cmpi ne, %29, %30 : vector<4x31xi32>
    %cst = arith.constant 0.000000e+00 : f32
    %32 = vector.broadcast %cst : f32 to vector<4x31xf32>
    %33 = vector.extract_strided_slice %12 {offsets = [0, 0], sizes = [4, 31], strides = [1, 1]} : vector<4x32xf32> to vector<4x31xf32>
    %34 = arith.select %31, %33, %32 : vector<4x31xi1>, vector<4x31xf32>
    %c0_23 = arith.constant 0 : index
    %c1_24 = arith.constant 1 : index
    %35 = vector.load %arg9[%c0_23, %c1_24] : memref<12x32xf32, #tpu.memory_space<vmem>>, vector<4x31xf32>
    tpu.vector_store %arg9[%c0_23, %c1_24], %34 {strides = array<i32>} : memref<12x32xf32, #tpu.memory_space<vmem>>, vector<4x31xf32>,
    %36 = vector.extract_strided_slice %12 {offsets = [0, 1], sizes = [4, 31], strides = [1, 1]} : vector<4x32xf32> to vector<4x31xf32>
    %37 = arith.select %31, %36, %32 : vector<4x31xi1>, vector<4x31xf32>
    %c8 = arith.constant 8 : index
    %c0_25 = arith.constant 0 : index
    %38 = vector.load %arg9[%c8, %c0_25] : memref<12x32xf32, #tpu.memory_space<vmem>>, vector<4x31xf32>
    tpu.vector_store %arg9[%c8, %c0_25], %37 {strides = array<i32>} : memref<12x32xf32, #tpu.memory_space<vmem>>, vector<4x31xf32>,
    %cst_26 = arith.constant 0.000000e+00 : f32
    %39 = vector.broadcast %cst_26 : f32 to vector<4x1xf32>
    %c0_27 = arith.constant 0 : index
    %c0_28 = arith.constant 0 : index
    %40 = vector.load %arg9[%c0_27, %c0_28] : memref<12x32xf32, #tpu.memory_space<vmem>>, vector<4x1xf32>
    tpu.vector_store %arg9[%c0_27, %c0_28], %39 {strides = array<i32>} : memref<12x32xf32, #tpu.memory_space<vmem>>, vector<4x1xf32>,
    %cst_29 = arith.constant 0.000000e+00 : f32
    %41 = vector.broadcast %cst_29 : f32 to vector<4x1xf32>
    %c8_30 = arith.constant 8 : index
    %c31 = arith.constant 31 : index
    %42 = vector.load %arg9[%c8_30, %c31] : memref<12x32xf32, #tpu.memory_space<vmem>>, vector<4x1xf32>
    tpu.vector_store %arg9[%c8_30, %c31], %41 {strides = array<i32>} : memref<12x32xf32, #tpu.memory_space<vmem>>, vector<4x1xf32>,
    %c0_31 = arith.constant 0 : index
    %c0_32 = arith.constant 0 : index
    %43 = vector.load %arg9[%c0_31, %c0_32] : memref<12x32xf32, #tpu.memory_space<vmem>>, vector<12x32xf32>
    %cst_33 = arith.constant dense<0.000000e+00> : vector<32x32xf32>
    %44 = tpu.matmul %0, %43, %cst_33 {dimension_numbers = #tpu.dot_dimension_numbers<[1], [0], [0], [1], [0, 0, 1, 1], [], []>} : vector<32x12xf32>, vector<12x32xf32>, vector<32x32xf32> -> vector<32x32xf32>
    %45 = vector.broadcast %1 : vector<32x1xf32> to vector<32x32xf32>
    %46 = arith.addf %44, %45 : vector<32x32xf32>
    %cst_34 = arith.constant 0.000000e+00 : f32
    %47 = vector.broadcast %cst_34 : f32 to vector<32x32xf32>
    %48 = arith.maximumf %46, %47 : vector<32x32xf32>
    %cst_35 = arith.constant dense<0.000000e+00> : vector<32x32xf32>
    %49 = tpu.matmul %2, %48, %cst_35 {dimension_numbers = #tpu.dot_dimension_numbers<[1], [0], [0], [1], [0, 0, 1, 1], [], []>} : vector<32x32xf32>, vector<32x32xf32>, vector<32x32xf32> -> vector<32x32xf32>
    %50 = vector.broadcast %3 : vector<32x1xf32> to vector<32x32xf32>
    %51 = arith.addf %49, %50 : vector<32x32xf32>
    %cst_36 = arith.constant 0.000000e+00 : f32
    %52 = vector.broadcast %cst_36 : f32 to vector<32x32xf32>
    %53 = arith.maximumf %51, %52 : vector<32x32xf32>
    %c32 = arith.constant 32 : index
    %c0_37 = arith.constant 0 : index
    %54 = vector.load %arg10[%c32, %c0_37] : memref<96x32xf32, #tpu.memory_space<vmem>>, vector<32x32xf32>
    tpu.vector_store %arg10[%c32, %c0_37], %53 {strides = array<i32>} : memref<96x32xf32, #tpu.memory_space<vmem>>, vector<32x32xf32>,
    %55 = tpu.iota {dimensions = array<i32: 1>} : vector<32x31xi32>
    %c16_i32_38 = arith.constant 16 : i32
    %c0_i32_39 = arith.constant 0 : i32
    %56 = arith.cmpi eq, %c16_i32_38, %c0_i32_39 : i32
    %c1_i32_40 = arith.constant 1 : i32
    %57 = arith.select %56, %c1_i32_40, %c16_i32_38 : i32
    %58 = vector.broadcast %57 : i32 to vector<32x31xi32>
    %59 = arith.remsi %55, %58 : vector<32x31xi32>
    %c0_i32_41 = arith.constant 0 : i32
    %60 = vector.broadcast %c0_i32_41 : i32 to vector<32x31xi32>
    %61 = arith.cmpi ne, %59, %60 : vector<32x31xi32>
    %c0_i32_42 = arith.constant 0 : i32
    %62 = vector.broadcast %c0_i32_42 : i32 to vector<32x31xi32>
    %63 = arith.cmpi slt, %59, %62 : vector<32x31xi32>
    %c0_i32_43 = arith.constant 0 : i32
    %64 = arith.cmpi slt, %57, %c0_i32_43 : i32
    %65 = vector.broadcast %64 : i1 to vector<32x31xi1>
    %66 = vector.broadcast %65 : vector<32x31xi1> to vector<32x31xi1>
    %67 = arith.xori %63, %66 : vector<32x31xi1>
    %68 = arith.andi %67, %61 : vector<32x31xi1>
    %69 = vector.broadcast %57 : i32 to vector<32x31xi32>
    %70 = arith.addi %59, %69 : vector<32x31xi32>
    %71 = arith.select %68, %70, %59 : vector<32x31xi1>, vector<32x31xi32>
    %c15_i32_44 = arith.constant 15 : i32
    %72 = vector.broadcast %c15_i32_44 : i32 to vector<32x31xi32>
    %73 = arith.cmpi ne, %71, %72 : vector<32x31xi32>
    %cst_45 = arith.constant 0.000000e+00 : f32
    %74 = vector.broadcast %cst_45 : f32 to vector<32x31xf32>
    %75 = vector.extract_strided_slice %53 {offsets = [0, 0], sizes = [32, 31], strides = [1, 1]} : vector<32x32xf32> to vector<32x31xf32>
    %76 = arith.select %73, %75, %74 : vector<32x31xi1>, vector<32x31xf32>
    %c0_46 = arith.constant 0 : index
    %c1_47 = arith.constant 1 : index
    %77 = vector.load %arg10[%c0_46, %c1_47] : memref<96x32xf32, #tpu.memory_space<vmem>>, vector<32x31xf32>
    tpu.vector_store %arg10[%c0_46, %c1_47], %76 {strides = array<i32>} : memref<96x32xf32, #tpu.memory_space<vmem>>, vector<32x31xf32>,
    %78 = vector.extract_strided_slice %53 {offsets = [0, 1], sizes = [32, 31], strides = [1, 1]} : vector<32x32xf32> to vector<32x31xf32>
    %79 = arith.select %73, %78, %74 : vector<32x31xi1>, vector<32x31xf32>
    %c64 = arith.constant 64 : index
    %c0_48 = arith.constant 0 : index
    %80 = vector.load %arg10[%c64, %c0_48] : memref<96x32xf32, #tpu.memory_space<vmem>>, vector<32x31xf32>
    tpu.vector_store %arg10[%c64, %c0_48], %79 {strides = array<i32>} : memref<96x32xf32, #tpu.memory_space<vmem>>, vector<32x31xf32>,
    %cst_49 = arith.constant 0.000000e+00 : f32
    %81 = vector.broadcast %cst_49 : f32 to vector<32x1xf32>
    %c0_50 = arith.constant 0 : index
    %c0_51 = arith.constant 0 : index
    %82 = vector.load %arg10[%c0_50, %c0_51] : memref<96x32xf32, #tpu.memory_space<vmem>>, vector<32x1xf32>
    tpu.vector_store %arg10[%c0_50, %c0_51], %81 {strides = array<i32>} : memref<96x32xf32, #tpu.memory_space<vmem>>, vector<32x1xf32>,
    %cst_52 = arith.constant 0.000000e+00 : f32
    %83 = vector.broadcast %cst_52 : f32 to vector<32x1xf32>
    %c64_53 = arith.constant 64 : index
    %c31_54 = arith.constant 31 : index
    %84 = vector.load %arg10[%c64_53, %c31_54] : memref<96x32xf32, #tpu.memory_space<vmem>>, vector<32x1xf32>
    tpu.vector_store %arg10[%c64_53, %c31_54], %83 {strides = array<i32>} : memref<96x32xf32, #tpu.memory_space<vmem>>, vector<32x1xf32>,
    %c0_55 = arith.constant 0 : index
    %c0_56 = arith.constant 0 : index
    %85 = vector.load %arg10[%c0_55, %c0_56] : memref<96x32xf32, #tpu.memory_space<vmem>>, vector<96x32xf32>
    %cst_57 = arith.constant dense<0.000000e+00> : vector<8x32xf32>
    %86 = tpu.matmul %4, %85, %cst_57 {dimension_numbers = #tpu.dot_dimension_numbers<[1], [0], [0], [1], [0, 0, 1, 1], [], []>} : vector<8x96xf32>, vector<96x32xf32>, vector<8x32xf32> -> vector<8x32xf32>
    %87 = vector.broadcast %5 : vector<8x1xf32> to vector<8x32xf32>
    %88 = arith.addf %86, %87 : vector<8x32xf32>
    %89 = vector.extract_strided_slice %88 {offsets = [0, 0], sizes = [8, 16], strides = [1, 1]} : vector<8x32xf32> to vector<8x16xf32>
    %c0_58 = arith.constant 0 : index
    %c0_59 = arith.constant 0 : index
    %c0_60 = arith.constant 0 : index
    %90 = vector.load %arg8[%c0_58, %c0_59, %c0_60] : memref<2x8x16xf32, #tpu.memory_space<vmem>>, vector<1x8x16xf32>
    %91 = vector.shape_cast %90 : vector<1x8x16xf32> to vector<8x16xf32>
    %92 = vector.shape_cast %89 : vector<8x16xf32> to vector<1x8x16xf32>
    tpu.vector_store %arg8[%c0_58, %c0_59, %c0_60], %92 {strides = array<i32>} : memref<2x8x16xf32, #tpu.memory_space<vmem>>, vector<1x8x16xf32>,
    %93 = vector.extract_strided_slice %88 {offsets = [0, 16], sizes = [8, 16], strides = [1, 1]} : vector<8x32xf32> to vector<8x16xf32>
    %c1_61 = arith.constant 1 : index
    %c0_62 = arith.constant 0 : index
    %c0_63 = arith.constant 0 : index
    %94 = vector.load %arg8[%c1_61, %c0_62, %c0_63] : memref<2x8x16xf32, #tpu.memory_space<vmem>>, vector<1x8x16xf32>
    %95 = vector.shape_cast %94 : vector<1x8x16xf32> to vector<8x16xf32>
    %96 = vector.shape_cast %93 : vector<8x16xf32> to vector<1x8x16xf32>
    tpu.vector_store %arg8[%c1_61, %c0_62, %c0_63], %96 {strides = array<i32>} : memref<2x8x16xf32, #tpu.memory_space<vmem>>, vector<1x8x16xf32>,
    return
  }
  func.func @transform_0(%arg0: i32) -> (i32, i32, i32) {
    %c0_i32 = arith.constant 0 : i32
    %c0_i32_0 = arith.constant 0 : i32
    %c0_i32_1 = arith.constant 0 : i32
    return %arg0, %c0_i32, %c0_i32_0 : i32, i32, i32
  }
  func.func @transform_1(%arg0: i32) -> (i32, i32) {
    %c0_i32 = arith.constant 0 : i32
    %c0_i32_0 = arith.constant 0 : i32
    %c0_i32_1 = arith.constant 0 : i32
    return %c0_i32, %c0_i32_0 : i32, i32
  }
  func.func @transform_2(%arg0: i32) -> (i32, i32) {
    %c0_i32 = arith.constant 0 : i32
    %c0_i32_0 = arith.constant 0 : i32
    %c0_i32_1 = arith.constant 0 : i32
    return %c0_i32, %c0_i32_0 : i32, i32
  }
  func.func @transform_3(%arg0: i32) -> (i32, i32) {
    %c0_i32 = arith.constant 0 : i32
    %c0_i32_0 = arith.constant 0 : i32
    %c0_i32_1 = arith.constant 0 : i32
    return %c0_i32, %c0_i32_0 : i32, i32
  }
  func.func @transform_4(%arg0: i32) -> (i32, i32) {
    %c0_i32 = arith.constant 0 : i32
    %c0_i32_0 = arith.constant 0 : i32
    %c0_i32_1 = arith.constant 0 : i32
    return %c0_i32, %c0_i32_0 : i32, i32
  }
  func.func @transform_5(%arg0: i32) -> (i32, i32) {
    %c0_i32 = arith.constant 0 : i32
    %c0_i32_0 = arith.constant 0 : i32
    %c0_i32_1 = arith.constant 0 : i32
    return %c0_i32, %c0_i32_0 : i32, i32
  }
  func.func @transform_6(%arg0: i32) -> (i32, i32) {
    %c0_i32 = arith.constant 0 : i32
    %c0_i32_0 = arith.constant 0 : i32
    %c0_i32_1 = arith.constant 0 : i32
    return %c0_i32, %c0_i32_0 : i32, i32
  }
  func.func @transform_7(%arg0: i32) -> (i32, i32, i32) {
    %c0_i32 = arith.constant 0 : i32
    %c0_i32_0 = arith.constant 0 : i32
    %c0_i32_1 = arith.constant 0 : i32
    return %arg0, %c0_i32, %c0_i32_0 : i32, i32, i32
  }
}

</mosaic_0001>

<bundles_post_ra>
// kernel: affine_coupling_network.1
= control target key start
LH: loop header
LB: loop body
LE: loop exit
PB: predicated region body
PF: predicated region fallthrough
CT: control target
= control target key end

     0   :  { %12 = vsyncpa [#allocation5], 0  ;;  %s1362_s0 = inlined_call_operand.vmem [shape: f32[4,4,16], index: 0, kind: input, shape index: {}]   ;;  %s1363_s1 = inlined_call_operand.vmem [shape: f32[32,12], index: 1, kind: input, shape index: {}]   ;;  %s1364_s2 = inlined_call_operand.vmem [shape: f32[32,1], index: 2, kind: input, shape index: {}]   ;;  %s1365_s3 = inlined_call_operand.vmem [shape: f32[32,32], index: 3, kind: input, shape index: {}]   ;;  %s1366_s4 = inlined_call_operand.vmem [shape: f32[32,1], index: 4, kind: input, shape index: {}]   ;;  %s1367_s5 = inlined_call_operand.vmem [shape: f32[8,96], index: 5, kind: input, shape index: {}]   ;;  %s1368_s6 = inlined_call_operand.vmem [shape: f32[8,1], index: 6, kind: input, shape index: {}]   ;;  %s1369_s7 = inlined_call_operand.hbm [shape: f32[4,8,16], index: 7, kind: output, shape index: {}]  }
   0x1   :  { %14 = vsyncpa [#allocation5 + $0x1], 0  ;;  %s1135_s24 = smov 0   ;;  %s1137_s25 = smov 0  }
   0x2   :  { %s1139_s26 = smov 0   ;;  %s1141_s27 = smov 0  }
   0x3 LB: > { %s1156_s28 = sadd.s32 4294967295, %s1081_s27   ;;  %s832_s29 = sadd.s32 4294967294, %s1081_s27   ;;  %s1081_s27 = sphi %s1141_s27, %s1377_s27   ;;  %s1077_s26 = sphi %s1139_s26, %s1376_s26   ;;  %s1073_s25 = sphi %s1137_s25, %s1375_s25   ;;  %s1069_s24 = sphi %s1135_s24, %s1374_s24  }
   0x4   : > { %s1160_s30 = sadd.s32 1, %s1081_s27   ;;  %s179_s8 = sadd.s32 1, %s1077_s26 }
   0x5   : > { %s176_s9 = ssub.s32 %s1081_s27, %s1160_s30  ;;  %p189_p0 = scmp.ne.s32.totalorder %s1077_s26, %s1073_s25 }
   0x6   : > { %p177_p1 = scmp.eq.s32.totalorder %s176_s9, 0  ;;  %p190_p2 = scmp.eq.s32.totalorder %s1156_s28, 1 }
   0x7   : > { %p195_p3 = scmp.ne.s32.totalorder %s1073_s25, %s1069_s24  ;;  %p196_p4 = scmp.eq.s32.totalorder %s832_s29, 1 }
   0x8   : > { %s1171_s10 = scalar_select %p177_p1, %s1077_s26, %s179_s8  }
   0x9   : > { %p1173_p5 = por %p190_p2, %p189_p0  ;;  %p1177_p6 = por %p196_p4, %p195_p3 }
   0xa   : > { %p835_p7 = scmp.ge.s32.totalorder %s1081_s27, 1  ;;  %p241_p8 = scmp.lt.s32.totalorder %s1081_s27, 3 }
   0xc   : > { %p242_p9 = pnand %p835_p7, %p241_p8 }
   0xd   : > { %s837_s13 = sshll.u32 (!%p242_p9), %s1156_s28, 1  ;;  %vm299_vm0 = vcmask (!%p242_p9), 125952   ;;  %s1083_s18 = smov (!%p242_p9), 16   ;;  %v310_v2 = vlaneseq (!%p242_p9)  ;;  %vm307_vm1 = vcmask (!%p242_p9), 257152   ;;  %v280_v9 = vld [vmem:[%s1363_s1] sm:$0xff] (!%p242_p9)  ;;  %vm365_vm3 = vcmask (!%p242_p9), 97280  }
   0xe   : > { %245 = sbr.rel (%p242_p9) target bundleno = 1220 (0x4c4), region = 48  ;;  %p274_p10 = scmp.lt.s32.totalorder (!%p242_p9), %s837_s13, 3  ;;  %888 = vmatprep.mubr.msk.f32.mxu1 (!%p242_p9), %vm365_vm3, %v280_v9  ;;  %v284_v10 = vld [vmem:[%s1364_s2] sm:$0xff] (!%p242_p9)  ;;  %v1086_v11 = vmov (!%p242_p9), 0   ;;  %v285_v12 = vld [vmem:[%s1364_s2 + $0x8] sm:$0xff] (!%p242_p9)  ;;  %v286_v13 = vld [vmem:[%s1364_s2 + $0x10] sm:$0xff] (!%p242_p9) }
   0xf   : > { %v311_v3 = vand.u32 (!%p242_p9), 127, %v310_v2  ;;  %s1084_s19 = smov (!%p242_p9), 127   ;;  %s1085_s22 = smov (!%p242_p9), 1   ;;  %1017 = vset.pattern.permute.xlu1 (!%p242_p9), %v1086_v11  ;;  %1018 = vset.pattern.permute.xlu0 (!%p242_p9), %v1086_v11  ;;  %v292_v14 = vld [vmem:[%s1366_s4] sm:$0xff] (!%p242_p9)  ;;  %v287_v15 = vld [vmem:[%s1364_s2 + $0x18] sm:$0xff] (!%p242_p9)  ;;  %v294_v16 = vld [vmem:[%s1366_s4 + $0x10] sm:$0xff] (!%p242_p9) }
  0x10   : > { %v293_v17 = vld [vmem:[%s1366_s4 + $0x8] sm:$0xff] (!%p242_p9)  ;;  %v295_v18 = vld [vmem:[%s1366_s4 + $0x18] sm:$0xff] (!%p242_p9)  ;;  %vm337_vm4 = vcmask (!%p242_p9), 248832   ;;  %vm330_vm5 = vcmask (!%p242_p9), 257032   ;;  %vm341_vm6 = vcmask (!%p242_p9), 257272   ;;  %vm339_vm7 = vcmask (!%p242_p9), 3072  }
  0x11   : > { %v316_v5 = vand.u32 (!%p242_p9), 15, %v311_v3  ;;  %v1087_v22 = vmov (!%p242_p9), 0.0   ;;  %vm378_vm8 = vcmask (!%p242_p9), 1043456   ;;  %vm1088_vm9 = vmmov (!%p242_p9), 1   ;;  %v281_v26 = vld [vmem:[%s1363_s1 + $0x8] sm:$0xff] (!%p242_p9)  ;;  %v282_v27 = vld [vmem:[%s1363_s1 + $0x10] sm:$0xff] (!%p242_p9) }
  0x12   : > { %vm936_vm10 = vmpackc.low (!%p242_p9), %vm378_vm8, %vm1088_vm9  ;;  %v283_v28 = vld [vmem:[%s1363_s1 + $0x18] sm:$0xff] (!%p242_p9)  ;;  %v288_v29 = vld [vmem:[%s1365_s3] sm:$0xff] (!%p242_p9)  ;;  %vm491_vm11 = vcmask (!%p242_p9), 261120   ;;  %v1089_v61 = vmov (!%p242_p9), 0.0|0.0   ;;  %vm1090_vm12 = vmmov (!%p242_p9), 0   ;;  %vm617_vm13 = vcmask (!%p242_p9), 261128  }
  0x13   : > { %vm1187_vm2 = vcmp.ne.s32.totalorder (!%p242_p9), %v316_v5, 15  ;;  %v289_v48 = vld [vmem:[%s1365_s3 + $0x8] sm:$0xff] (!%p242_p9)  ;;  %v290_v49 = vld [vmem:[%s1365_s3 + $0x10] sm:$0xff] (!%p242_p9)  ;;  %v291_v50 = vld [vmem:[%s1365_s3 + $0x18] sm:$0xff] (!%p242_p9)  ;;  %949 = vmatprep.subr.bf16.mxu0 (!%p242_p9), %v1089_v61  ;;  %932 = vmatprep.mubr.msk.f32.mxu0 (!%p242_p9), %vm1090_vm12, %v1087_v22  ;;  %vm647_vm14 = vcmask (!%p242_p9), 7168   ;;  %vm642_vm15 = vcmask (!%p242_p9), 252928  }
  0x14   : > { %v297_v9 = vld [vmem:[%s1368_s6] sm:$0xff] (!%p242_p9)  ;;  %s1091_s20 = smov (!%p242_p9), 112   ;;  %s856_s29 = sshll.u32 (!%p242_p9), %s1156_s28, 8 }
  0x15   : > { %s1379_s13 = smov (!%p274_p10, %s837_s13), 3  ;;  %s1092_s28 = smov [#allocation4]  }
  0x16   : > { %s838_s14 = sshll.u32 %s1379_s13, 2  ;;  %s1319_s13 = scalar_lea.hbm %s1369_s7, %s856_s29 }
  0x17   : > { %s277_s17 = scalar_lea.vmem %s1362_s0, %s838_s14  ;;  %s1023_s16 = sshll.u32 %s1092_s28, 4  ;;  %s1024_s16 = int_to_ptr.vmem [resolvable:$false] %s1023_s16 }
  0x18   : > { %v839_v0 = vld [vmem:[%s277_s17 + $0x4] sm:$0xf]  ;;  %v298_v1 = vld [vmem:[%s277_s17] sm:$0xf]  ;;  %s270_s17 = sand.u32 1, %s1073_s25  }
  0x19   : > { %304 = vrot.lane.b32.xlu0 %v839_v0, %s1083_s18  ;;  %300 = vst.msk [vmem:[#allocation2 + $0x4] sm:$0xf] %vm299_vm0, %v298_v1  ;;  %vm652_vm0 = vcmask 261368   ;;  %s836_s18 = sshll.u32 %s270_s17, 4  ;;  %s1321_s14 = scalar_lea.sflag [#allocation5], %s270_s17 }
  0x1a   : > { %s272_s21 = scalar_lea.vmem [#allocation4], %s836_s18 }
  0x1b   : > { %s770_s23 = sshll.u32 %s272_s21, 4  ;;  %s1314_s23 = int_to_ptr.vmem [resolvable:$true] %s770_s23 }
  0x1c   : > { %s1019_s15 = scalar_lea.vmem %s1314_s23, 256  ;;  %p1026_p0 = scmp.lt.s32.totalorder %s1314_s23, %s1024_s16 }
  0x1d   : > { %p1020_p11 = scmp.ne.s32.totalorder %s1314_s23, %s1019_s15 }
  0x1f   : > { %p1021_p12 = pnand %p1020_p11, %p1173_p5 }
  0x21   : > { %p1022_p13 = pneg %p1021_p12 }
  0x8b   : > { %v305_v4 = vpop.permute.xlu0 %304 }
  0x8c   : > { %308 = vst.msk [vmem:[#allocation2 + $0x4] sm:$0xf] %vm307_vm1, %v305_v4  ;;  %vm674_vm1 = vcmask 785408  }
  0x93   : > { %v309_v7 = vld [vmem:[#allocation2 + $0x4] sm:$0xf] }
  0x94   : > { %333 = vrot.lane.b32.xlu0 %v309_v7, %s1084_s19  ;;  %v325_v8 = vsel %vm1187_vm2, %v309_v7, 0.0 }
  0x95   : > { %327 = vrot.lane.b32.xlu1 %v325_v8, %s1085_s22 }
  0x98   : > { %352 = vperm.xlu0 %1018, %v285_v12  }
  0x99   : > { %347 = vperm.xlu1 %1017, %v284_v10  }
  0x9c   : > { %473 = vperm.xlu0 %1018, %v292_v14  }
  0x9d   : > { %357 = vperm.xlu1 %1017, %v286_v13  }
  0xa0   : > { %483 = vperm.xlu0 %1018, %v294_v16  }
  0xa1   : > { %362 = vperm.xlu1 %1017, %v287_v15  }
  0xa5   : > { %478 = vperm.xlu1 %1017, %v293_v17  }
  0xa9   : > { %488 = vperm.xlu1 %1017, %v295_v18  }
 0x106   : > { %v334_v19 = vpop.permute.xlu0 %333 }
 0x107   : > { %v336_v20 = vsel %vm1187_vm2, %v334_v19, 0.0  ;;  %v328_v21 = vpop.permute.xlu1 %327 }
 0x108   : > { %338 = vst.msk [vmem:[#allocation2 + $0x8] sm:$0xf] %vm337_vm4, %v336_v20 }
 0x109   : > { %331 = vst.msk [vmem:[#allocation2] sm:$0xf] %vm330_vm5, %v328_v21 }
 0x10a   : > { %342 = vst.msk [vmem:[#allocation2 + $0x8] sm:$0xf] %vm341_vm6, %v1087_v22 }
 0x10b   : > { %340 = vst.msk [vmem:[#allocation2] sm:$0xf] %vm339_vm7, %v1087_v22 }
 0x111   : > { %v344_v24 = vld [vmem:[#allocation2 + $0x8] sm:$0xf] }
 0x112   : > { %v343_v23 = vld [vmem:[#allocation2] sm:$0xff] }
 0x113   : > { %v935_v25 = vpack.c.bf16 %v344_v24, %v343_v23 }
 0x115   : > { %937 = vmatprep.subr.msk.bf16.mxu1 %vm936_vm10, %v935_v25 }
 0x116   : > { %940 = vmatpush3.bf16.msk.msra.mxu1 %vm936_vm10, %v935_v25 }
 0x117   : > { %v353_v32 = vpop.permute.xlu0 %352 }
 0x118   : > { %v348_v30 = vpop.permute.xlu1 %347 }
 0x119   : > { %889 = vmatmul.mubr.msk.f32.vlgmr.msra.gmra.mrb[0].mxu1 %vm365_vm3, %v281_v26 }
 0x11a   : > { %891 = vmatprep.mubr.msk.f32.mxu1 %vm365_vm3, %v282_v27 }
 0x11b   : > { %v474_v52 = vpop.permute.xlu0 %473 }
 0x11c   : > { %v358_v31 = vpop.permute.xlu1 %357 }
 0x11d   : > { %892 = vmatmul.mubr.msk.f32.gmra.mrb[2].mxu1 %vm365_vm3, %v283_v28 }
 0x11e   : > { %902 = vmatprep.mubr.msk.f32.mxu1 %vm491_vm11, %v288_v29 }
 0x11f   : > { %v484_v62 = vpop.permute.xlu0 %483 }
 0x120   : > { %v363_v38 = vpop.permute.xlu1 %362 }
 0x124   : > { %v479_v51 = vpop.permute.xlu1 %478 }
 0x128   : > { %v489_v58 = vpop.permute.xlu1 %488 }
 0x1ec   : > { %v890_v33 = vpop.f32.mrb[0].mxu1 }
 0x1ed   : > { %v454_v34 = vadd.f32 %v890_v33, %v353_v32  ;;  %v448_v35 = vpop.f32.mrb[1].mxu1 }
 0x1ee   : > { %v449_v36 = vadd.f32 %v448_v35, %v348_v30 }
 0x1ef   : > { %v468_v37 = vmax.f32 %v454_v34, 0.0 }
 0x1f0   : > { %v467_v39 = vmax.f32 %v449_v36, 0.0  ;;  %v893_v40 = vpop.f32.mrb[2].mxu1 }
 0x1f1   : > { %v464_v41 = vadd.f32 %v893_v40, %v363_v38  ;;  %v458_v42 = vpop.f32.mrb[3].mxu1 }
 0x1f2   : > { %v941_v43 = vpack.c.bf16 %v468_v37, %v467_v39  ;;  %v459_v44 = vadd.f32 %v458_v42, %v358_v31  ;;  %v296_v39 = vld [vmem:[%s1367_s5] sm:$0xff] }
 0x1f3   : > { %v470_v45 = vmax.f32 %v464_v41, 0.0 }
 0x1f4   : > { %v469_v46 = vmax.f32 %v459_v44, 0.0  ;;  %942 = vmatprep.subr.bf16.mxu1 %v941_v43 }
 0x1f5   : > { %944 = vmatpush3.bf16.msra.mxu1 %v941_v43 }
 0x1f6   : > { %v945_v47 = vpack.c.bf16 %v470_v45, %v469_v46 }
 0x1f8   : > { %946 = vmatprep.subr.bf16.mxu1 %v945_v47 }
 0x1f9   : > { %948 = vmatpush3.bf16.msra.mxu1 %v945_v47 }
 0x1fc   : > { %903 = vmatmul.mubr.msk.f32.vlgmr.msra.gmra.mrb[4].mxu1 %vm491_vm11, %v289_v48 }
 0x1fd   : > { %905 = vmatprep.mubr.msk.f32.mxu1 %vm491_vm11, %v290_v49 }
 0x200   : > { %906 = vmatmul.mubr.msk.f32.gmra.mrb[6].mxu1 %vm491_vm11, %v291_v50 }
 0x2cf   : > { %v904_v53 = vpop.f32.mrb[4].mxu1 }
 0x2d0   : > { %v576_v54 = vadd.f32 %v904_v53, %v479_v51  ;;  %v570_v55 = vpop.f32.mrb[5].mxu1 }
 0x2d1   : > { %v571_v56 = vadd.f32 %v570_v55, %v474_v52 }
 0x2d2   : > { %v590_v57 = vmax.f32 %v576_v54, 0.0 }
 0x2d3   : > { %v589_v59 = vmax.f32 %v571_v56, 0.0  ;;  %v907_v60 = vpop.f32.mrb[6].mxu1 }
 0x2d4   : > { %594 = vst.msk [vmem:[#allocation3 + $0x28] sm:$0xff] %vm491_vm11, %v590_v57  ;;  %v586_v63 = vadd.f32 %v907_v60, %v489_v58  ;;  %v580_v0 = vpop.f32.mrb[7].mxu1  ;;  %v598_v1 = vsel %vm1187_vm2, %v590_v57, 0.0 }
 0x2d5   : > { %593 = vst.msk [vmem:[#allocation3 + $0x20] sm:$0xff] %vm491_vm11, %v589_v59  ;;  %v581_v2 = vadd.f32 %v580_v0, %v484_v62  ;;  %607 = vrot.lane.b32.xlu1 %v598_v1, %s1085_s22  ;;  %v597_v3 = vsel %vm1187_vm2, %v589_v59, 0.0 }
 0x2d6   : > { %v592_v4 = vmax.f32 %v586_v63, 0.0  ;;  %605 = vrot.lane.b32.xlu0 %v597_v3, %s1085_s22 }
 0x2d7   : > { %v591_v5 = vmax.f32 %v581_v2, 0.0 }
 0x2d8   : > { %596 = vst.msk [vmem:[#allocation3 + $0x38] sm:$0xff] %vm491_vm11, %v592_v4  ;;  %v600_v7 = vsel %vm1187_vm2, %v592_v4, 0.0 }
 0x2d9   : > { %595 = vst.msk [vmem:[#allocation3 + $0x30] sm:$0xff] %vm491_vm11, %v591_v5  ;;  %611 = vrot.lane.b32.xlu1 %v600_v7, %s1085_s22  ;;  %v599_v8 = vsel %vm1187_vm2, %v591_v5, 0.0 }
 0x2da   : > { %609 = vrot.lane.b32.xlu0 %v599_v8, %s1085_s22 }
 0x2db   : > { %v662_v30 = vld [vmem:[#allocation3 + $0x28] sm:$0xff] }
 0x2dc   : > { %v661_v29 = vld [vmem:[#allocation3 + $0x20] sm:$0xff] }
 0x2dd   : > { %628 = vrot.lane.b32.xlu1 %v590_v57, %s1084_s19  ;;  %v956_v31 = vpack.c.bf16 %v662_v30, %v661_v29 }
 0x2de   : > { %626 = vrot.lane.b32.xlu0 %v589_v59, %s1084_s19 }
 0x2df   : > { %v664_v32 = vld [vmem:[#allocation3 + $0x38] sm:$0xff] }
 0x2e0   : > { %v663_v6 = vld [vmem:[#allocation3 + $0x30] sm:$0xff] }
 0x2e1   : > { %632 = vrot.lane.b32.xlu1 %v592_v4, %s1084_s19  ;;  %v959_v35 = vpack.c.bf16 %v664_v32, %v663_v6 }
 0x2e2   : > { %630 = vrot.lane.b32.xlu0 %v591_v5, %s1084_s19  ;;  %s1025_s19 = scalar_lea.vmem %s1024_s16, 512 }
 0x2e3   : > { %p1027_p1 = scmp.lt.s32.totalorder %s1025_s19, %s1019_s15 }
 0x2e5   : > { %p1028_p2 = por %p1027_p1, %p1026_p0 }
 0x2e6   : > { %671 = vperm.xlu0 %1018, %v297_v9  }
 0x2e7   : > { %p1029_p3 = pnand %p1028_p2, %p1022_p13 }
 0x347   : > { %v608_v10 = vpop.permute.xlu1 %607 }
 0x348   : > { %619 = vst.msk [vmem:[#allocation3 + $0x8] sm:$0xff] %vm617_vm13, %v608_v10  ;;  %v606_v11 = vpop.permute.xlu0 %605 }
 0x349   : > { %649 = vst.msk [vmem:[#allocation3 + $0x8] sm:$0xff] %vm647_vm14, %v1087_v22 }
 0x34a   : > { %618 = vst.msk [vmem:[#allocation3] sm:$0xff] %vm617_vm13, %v606_v11 }
 0x34b   : > { %648 = vst.msk [vmem:[#allocation3] sm:$0xff] %vm647_vm14, %v1087_v22  ;;  %v612_v12 = vpop.permute.xlu1 %611 }
 0x34c   : > { %621 = vst.msk [vmem:[#allocation3 + $0x18] sm:$0xff] %vm617_vm13, %v612_v12  ;;  %v610_v13 = vpop.permute.xlu0 %609 }
 0x34d   : > { %651 = vst.msk [vmem:[#allocation3 + $0x18] sm:$0xff] %vm647_vm14, %v1087_v22 }
 0x34e   : > { %620 = vst.msk [vmem:[#allocation3 + $0x10] sm:$0xff] %vm617_vm13, %v610_v13 }
 0x34f   : > { %650 = vst.msk [vmem:[#allocation3 + $0x10] sm:$0xff] %vm647_vm14, %v1087_v22  ;;  %v629_v14 = vpop.permute.xlu1 %628 }
 0x350   : > { %v639_v15 = vsel %vm1187_vm2, %v629_v14, 0.0  ;;  %v627_v16 = vpop.permute.xlu0 %626  ;;  %v658_v17 = vld [vmem:[#allocation3 + $0x8] sm:$0xff] }
 0x351   : > { %644 = vst.msk [vmem:[#allocation3 + $0x48] sm:$0xff] %vm642_vm15, %v639_v15  ;;  %v638_v18 = vsel %vm1187_vm2, %v627_v16, 0.0 }
 0x352   : > { %v657_v19 = vld [vmem:[#allocation3] sm:$0xff]  ;;  %654 = vst.msk [vmem:[#allocation3 + $0x48] sm:$0xff] %vm652_vm0, %v1087_v22 }
 0x353   : > { %643 = vst.msk [vmem:[#allocation3 + $0x40] sm:$0xff] %vm642_vm15, %v638_v18  ;;  %v950_v20 = vpack.c.bf16 %v658_v17, %v657_v19  ;;  %v633_v21 = vpop.permute.xlu1 %632 }
 0x354   : > { %653 = vst.msk [vmem:[#allocation3 + $0x40] sm:$0xff] %vm652_vm0, %v1087_v22  ;;  %v641_v23 = vsel %vm1187_vm2, %v633_v21, 0.0  ;;  %v631_v24 = vpop.permute.xlu0 %630  ;;  %v660_v25 = vld [vmem:[#allocation3 + $0x18] sm:$0xff] }
 0x355   : > { %951 = vmatpush3.bf16.msra.mxu0 %v950_v20  ;;  %646 = vst.msk [vmem:[#allocation3 + $0x58] sm:$0xff] %vm642_vm15, %v641_v23  ;;  %v640_v26 = vsel %vm1187_vm2, %v631_v24, 0.0  ;;  %vm748_vm2 = vcmask 130048  }
 0x356   : > { %952 = vmatprep.subr.bf16.mxu0 %v1089_v61  ;;  %v659_v27 = vld [vmem:[#allocation3 + $0x10] sm:$0xff]  ;;  %656 = vst.msk [vmem:[#allocation3 + $0x58] sm:$0xff] %vm652_vm0, %v1087_v22 }
 0x357   : > { %645 = vst.msk [vmem:[#allocation3 + $0x50] sm:$0xff] %vm642_vm15, %v640_v26  ;;  %v953_v28 = vpack.c.bf16 %v660_v25, %v659_v27 }
 0x358   : > { %655 = vst.msk [vmem:[#allocation3 + $0x50] sm:$0xff] %vm652_vm0, %v1087_v22 }
 0x359   : > { %954 = vmatpush3.bf16.msra.mxu0 %v953_v28  ;;  %v666_v34 = vld [vmem:[#allocation3 + $0x48] sm:$0xff] }
 0x35a   : > { %955 = vmatprep.subr.bf16.mxu0 %v1089_v61 }
 0x35b   : > { %v665_v33 = vld [vmem:[#allocation3 + $0x40] sm:$0xff] }
 0x35c   : > { %v962_v36 = vpack.c.bf16 %v666_v34, %v665_v33 }
 0x35d   : > { %957 = vmatpush3.bf16.msra.mxu0 %v956_v31  ;;  %v668_v37 = vld [vmem:[#allocation3 + $0x58] sm:$0xff] }
 0x35e   : > { %958 = vmatprep.subr.bf16.mxu0 %v1089_v61 }
 0x35f   : > { %v667_v22 = vld [vmem:[#allocation3 + $0x50] sm:$0xff] }
 0x360   : > { %v965_v38 = vpack.c.bf16 %v668_v37, %v667_v22 }
 0x361   : > { %960 = vmatpush3.bf16.msra.mxu0 %v959_v35 }
 0x362   : > { %961 = vmatprep.subr.bf16.mxu0 %v1089_v61 }
 0x365   : > { %963 = vmatpush3.bf16.msra.mxu0 %v962_v36  ;;  %v672_v40 = vpop.permute.xlu0 %671 }
 0x366   : > { %964 = vmatprep.subr.bf16.mxu0 %v1089_v61 }
 0x369   : > { %966 = vmatpush3.bf16.msra.mxu0 %v965_v38 }
 0x36c   : > { %933 = vmatmul.mubr.msk.f32.vlgmr.msra.gmra.mrb[0].mxu0 %vm674_vm1, %v296_v39 }
 0x43f   : > { %v744_v41 = vpop.f32.mrb[0].mxu0 }
 0x440   : > { %v745_v42 = vadd.f32 %v744_v41, %v672_v40  ;;  %v934_v43 = vpop.f32.mrb[1].mxu0 }
 0x442   : > { %751 = vrot.lane.b32.xlu1 %v745_v42, %s1091_s20  ;;  %749 = vst.msk [vmem:[%s272_s21] sm:$0xff] %vm748_vm2, %v745_v42 }
 0x4b4   : > { %v752_v44 = vpop.permute.xlu1 %751 }
 0x4b5   : > { %850 = vst.msk [vmem:[%s272_s21 + $0x8] sm:$0xff] %vm748_vm2, %v752_v44 }
 0x4b6   : > { %1032 = shalt.err (!%p1029_p3)
}
 0x4b7   : > { %s1033_s22 = scalar_lea.hbm %s1319_s13, 256  ;;  %s1037_s20 = scalar_lea.hbm %s1369_s7, 512 }
 0x4b8   : > { %p1034_p4 = scmp.ne.s32.totalorder %s1319_s13, %s1033_s22  ;;  %p1038_p9 = scmp.lt.u32.totalorder %s1319_s13, %s1369_s7 }
 0x4b9   : > { %p1039_p10 = scmp.lt.u32.totalorder %s1037_s20, %s1033_s22  ;;  %p1041_p12 = scmp.lt.u32.totalorder %s1033_s22, %s1319_s13 }
 0x4ba   : > { %p1035_p7 = pnand %p1034_p4, %p1173_p5 }
 0x4bb   : > { %p1040_p11 = por %p1039_p10, %p1038_p9 }
 0x4bc   : > { %p1036_p8 = pneg %p1035_p7 }
 0x4bd   : > { %p1042_p13 = por %p1041_p12, %p1040_p11 }
 0x4bf   : > { %p1043_p0 = pnand %p1042_p13, %p1036_p8 }
 0x4c1   : > { %1046 = shalt.err (!%p1043_p0)
}
 0x4c2   : > { %s1093_s8 = smov 128   ;;  %s1094_s9 = smov 8  }
 0x4c3   : > { %967 = dma.vmem_to_hbm [thread:$0]  (%p1173_p5), %s1314_s23, 256, %s1319_s13, %s1321_s14, %s1093_s8, %s1093_s8, %s1094_s9  }
 0x4c4 PF: > { %p973_p1 = scmp.ge.s32.totalorder %s1081_s27, 2  ;;  %s785_s15 = sand.u32 1, %s1069_s24  }
 0x4c5   : > { %s786_s28 = scalar_lea.sflag [#allocation5], %s785_s15 }
 0x4c6   : > { %p970_p2 = pnand %p973_p1, %p1177_p6 }
 0x4c8   : > { %1064 = dma.done.wait (!%p970_p2), %s786_s28, 256  }
 0x4c9   : > { %1066 = vsyncadd (!%p970_p2), %s786_s28, 4294967040  ;;  %p17_p3 = scmp.ge.s32.totalorder %s1160_s30, 4   ;;  %s1374_s24 = smov %s1073_s25 }
 0x4ca   : > { %s1375_s25 = smov %s1077_s26  ;;  %s1376_s26 = smov %s1171_s10 }
 0x4cb   : > { %s1377_s27 = smov %s1160_s30  ;;  %19 = sbr.rel (!%p17_p3) target bundleno = 3 (0x3), region = 85 }
 0x4d2   :  { %791 = vsyncpa [#allocation5], 1 }
 0x4d3   :  { %793 = vsyncpa [#allocation5 + $0x1], 1 }

</bundles_post_ra>
